<compile_context>
chip_gen: v7x
topology: tpu7x:2x2x1
jax: 0.10.0
libtpu: 0.0.40
codegen_flags: <defaults>
</compile_context>

<pallas_src>
from functools import partial

import jax
import jax.numpy as jnp
from jax.experimental import pallas as pl
from jax.experimental.pallas import tpu as pltpu


_LANE = 128          # lane width
_BF16_SUBLANE = 16   # bf16 packed sublane tile height
_MAX_TB = 128        # batch tile (rows per grid step)


def _round_up(v: int, m: int) -> int:
    return (v + m - 1) // m * m


def _heads_kernel(x_ref, wpol_ref, bpol_ref, wval_ref, bval_ref, pol_ref, val_ref):
    # x_ref:    (TB, D)    bf16 VMEM
    # wpol_ref: (D,  Ap)   bf16 VMEM   (policy weight, lane-padded to 128)
    # bpol_ref: (1,  Ap)   f32  VMEM
    # wval_ref: (1,  D)    bf16 VMEM   (value weight as a single row)
    # bval_ref: (1,  1)    f32  SMEM   (value bias scalar)
    # pol_ref:  (TB, Ap)   f32  out
    # val_ref:  (TB, 128)  f32  out    (value replicated across lanes; col 0 used)
    x = x_ref[...]

    # Policy head on the MXU, f32 accumulation.
    acc = jnp.dot(x, wpol_ref[...], preferred_element_type=jnp.float32)
    pol_ref[...] = acc + bpol_ref[...]

    # Value head: a single output column -> VPU multiply + XLU cross-lane
    # reduce (sits in otherwise-idle slots; no extra 128-lane weight block).
    xf = x.astype(jnp.float32)
    wv = wval_ref[...].astype(jnp.float32)                      # (1, D)
    v = jnp.sum(xf * wv, axis=-1, keepdims=True) + bval_ref[0, 0]   # (TB, 1)
    val_ref[...] = jnp.broadcast_to(jnp.tanh(v), val_ref.shape)


def pack_params(wp, bp, wv, bv):
    """One-time (model-init) weight packing; keep the result cached and pass it
    into base_game_model_forward so no repack happens per inference call.

    wp: (D, A), bp: (1, A) or (A,), wv: (D, 1) or (D,), bv: scalar-like."""
    D, A = wp.shape
    Ap = _round_up(A, _LANE)
    w_pol = jnp.zeros((D, Ap), jnp.bfloat16).at[:, :A].set(wp.astype(jnp.bfloat16))
    b_pol = jnp.zeros((1, Ap), jnp.float32).at[:, :A].set(
        jnp.asarray(bp, jnp.float32).reshape(1, A))
    wv_row = jnp.asarray(wv, jnp.bfloat16).reshape(1, D)
    bv_s = jnp.asarray(bv, jnp.float32).reshape(1, 1)
    return w_pol, b_pol, wv_row, bv_s


@partial(jax.jit, static_argnames=("num_actions",))
def base_game_model_forward(x_nchw, w_pol, b_pol, wv_row, bv_s, *, num_actions):
    """x_nchw: (B, C, H, W) f32; packed params from pack_params().

    Returns (policy_logits (B, num_actions) f32, value (B, 1) f32)."""
    B, C, H, W = x_nchw.shape
    D = C * H * W
    Ap = w_pol.shape[1]

    # Batch tiling: round to the bf16 sublane tile; cap the per-step tile so a
    # large batch becomes a multi-step grid that shards across TCs (v7x).
    TB = min(_round_up(max(B, 1), _BF16_SUBLANE), _MAX_TB)
    Bp = _round_up(B, TB)

    # Flatten exactly like torch's x.view(B, -1); pad batch; cast bf16.
    x_flat = x_nchw.reshape(B, D).astype(jnp.bfloat16)
    x_pad = jnp.zeros((Bp, D), jnp.bfloat16).at[:B].set(x_flat)

    cost = pl.CostEstimate(
        flops=2 * Bp * D * Ap + 2 * Bp * D,
        transcendentals=Bp,
        bytes_accessed=(Bp * D * 2 + D * Ap * 2 + Ap * 4 + D * 2 + 4
                        + Bp * Ap * 4 + Bp * _LANE * 4),
    )

    pol_p, val_p = pl.pallas_call(
        _heads_kernel,
        out_shape=(
            jax.ShapeDtypeStruct((Bp, Ap), jnp.float32),
            jax.ShapeDtypeStruct((Bp, _LANE), jnp.float32),
        ),
        grid=(Bp // TB,),
        in_specs=[
            pl.BlockSpec((TB, D), lambda i: (i, 0)),
            pl.BlockSpec((D, Ap), lambda i: (0, 0)),   # weight resident across steps
            pl.BlockSpec((1, Ap), lambda i: (0, 0)),
            pl.BlockSpec((1, D), lambda i: (0, 0)),
            pl.BlockSpec(memory_space=pltpu.MemorySpace.SMEM),
        ],
        out_specs=(
            pl.BlockSpec((TB, Ap), lambda i: (i, 0)),
            pl.BlockSpec((TB, _LANE), lambda i: (i, 0)),
        ),
        cost_estimate=cost,
        compiler_params=pltpu.CompilerParams(dimension_semantics=("parallel",)),
    )(x_pad, w_pol, b_pol, wv_row, bv_s)

    # TODO(synk): MCTS callers should batch leaf evaluations so B reaches 128+;
    # at B=2 the call is still dominated by the weight DMA + fixed overhead.
    return pol_p[:B, :num_actions], val_p[:B, :1]


if __name__ == "__main__":
    # Small config consistent with the module contract (ModelMetadata).
    B, C, H, W = 2, 4, 16, 16
    num_actions = H * W           # 256
    D = C * H * W                 # 1024

    key = jax.random.PRNGKey(0)
    kx, kwp, kbp, kwv, kbv = jax.random.split(key, 5)

    x = jax.random.normal(kx, (B, C, H, W), dtype=jnp.float32)
    wp = jax.random.normal(kwp, (D, num_actions), dtype=jnp.float32) * 0.02
    bp = jax.random.normal(kbp, (1, num_actions), dtype=jnp.float32) * 0.02
    wv = jax.random.normal(kwv, (D, 1), dtype=jnp.float32) * 0.02
    bv = jax.random.normal(kbv, (1, 1), dtype=jnp.float32) * 0.02

    # Weight packing done ONCE at model-init time (hoisted out of the jit path).
    packed = pack_params(wp, bp, wv, bv)
    packed = jax.block_until_ready(packed)

    pol, val = base_game_model_forward(x, *packed, num_actions=num_actions)
    jax.block_until_ready((pol, val))

    # Pure-JAX reference with matching bf16 input precision + f32 accumulation.
    x_bf = x.reshape(B, D).astype(jnp.bfloat16).astype(jnp.float32)
    wp_bf = wp.astype(jnp.bfloat16).astype(jnp.float32)
    wv_bf = wv.astype(jnp.bfloat16).astype(jnp.float32)
    pol_ref = x_bf @ wp_bf + bp
    val_ref = jnp.tanh(x_bf @ wv_bf + bv)

    assert pol.shape == (B, num_actions) and val.shape == (B, 1)
    assert jnp.allclose(pol, pol_ref, atol=2e-3, rtol=2e-3)
    assert jnp.allclose(val, val_ref, atol=2e-3, rtol=2e-3)
    # Sanity vs. full-f32 reference (bf16 quantization only).
    assert jnp.allclose(pol, x.reshape(B, D) @ wp + bp, atol=5e-2, rtol=5e-2)
    assert jnp.allclose(val, jnp.tanh(x.reshape(B, D) @ wv + bv), atol=5e-2, rtol=5e-2)

    print("KERNEL_OK")
</pallas_src>

<mosaic_0001>
module attributes {stable_mosaic.version = 11 : i64} {
  func.func @_heads_kernel(%arg0: i32, %arg1: memref<16x1024xbf16, #tpu.memory_space<vmem>>, %arg2: memref<1024x256xbf16, #tpu.memory_space<vmem>>, %arg3: memref<1x256xf32, #tpu.memory_space<vmem>>, %arg4: memref<1x1024xbf16, #tpu.memory_space<vmem>>, %arg5: memref<1x1xf32, #tpu.memory_space<smem>>, %arg6: memref<16x256xf32, #tpu.memory_space<vmem>>, %arg7: memref<16x128xf32, #tpu.memory_space<vmem>>) attributes {dimension_semantics = [#tpu.dimension_semantics<parallel>], iteration_bounds = array<i64: 1>, scalar_prefetch = 0 : i64, scratch_operands = 0 : i64, tpu.core_type = #tpu.core_type<tc>, window_params = [{transform_indices = @transform_0, window_bounds = array<i64: 16, 1024>}, {pipeline_mode = #tpu.pipeline_mode<synchronous>, transform_indices = @transform_1, window_bounds = array<i64: 1024, 256>}, {pipeline_mode = #tpu.pipeline_mode<synchronous>, transform_indices = @transform_2, window_bounds = array<i64: 1, 256>}, {pipeline_mode = #tpu.pipeline_mode<synchronous>, transform_indices = @transform_3, window_bounds = array<i64: 1, 1024>}, {transform_indices = @transform_4, window_bounds = array<i64: 1, 1>}, {transform_indices = @transform_5, window_bounds = array<i64: 16, 256>}, {transform_indices = @transform_6, window_bounds = array<i64: 16, 128>}]} {
    %c0 = arith.constant 0 : index
    %c0_0 = arith.constant 0 : index
    %0 = vector.load %arg1[%c0, %c0_0] : memref<16x1024xbf16, #tpu.memory_space<vmem>>, vector<16x1024xbf16>
    %c0_1 = arith.constant 0 : index
    %c0_2 = arith.constant 0 : index
    %1 = vector.load %arg2[%c0_1, %c0_2] : memref<1024x256xbf16, #tpu.memory_space<vmem>>, vector<1024x256xbf16>
    %cst = arith.constant dense<0.000000e+00> : vector<16x256xf32>
    %2 = tpu.matmul %0, %1, %cst {dimension_numbers = #tpu.dot_dimension_numbers<[1], [0], [0], [1], [0, 0, 1, 1], [], []>} : vector<16x1024xbf16>, vector<1024x256xbf16>, vector<16x256xf32> -> vector<16x256xf32>
    %c0_3 = arith.constant 0 : index
    %c0_4 = arith.constant 0 : index
    %3 = vector.load %arg3[%c0_3, %c0_4] : memref<1x256xf32, #tpu.memory_space<vmem>>, vector<1x256xf32>
    %4 = vector.broadcast %3 : vector<1x256xf32> to vector<16x256xf32>
    %5 = arith.addf %2, %4 : vector<16x256xf32>
    %c0_5 = arith.constant 0 : index
    %c0_6 = arith.constant 0 : index
    %6 = vector.load %arg6[%c0_5, %c0_6] : memref<16x256xf32, #tpu.memory_space<vmem>>, vector<16x256xf32>
    tpu.vector_store %arg6[%c0_5, %c0_6], %5 {strides = array<i32>} : memref<16x256xf32, #tpu.memory_space<vmem>>, vector<16x256xf32>,
    %7 = arith.extf %0 : vector<16x1024xbf16> to vector<16x1024xf32>
    %c0_7 = arith.constant 0 : index
    %c0_8 = arith.constant 0 : index
    %8 = vector.load %arg4[%c0_7, %c0_8] : memref<1x1024xbf16, #tpu.memory_space<vmem>>, vector<1x1024xbf16>
    %9 = arith.extf %8 : vector<1x1024xbf16> to vector<1x1024xf32>
    %10 = vector.broadcast %9 : vector<1x1024xf32> to vector<16x1024xf32>
    %11 = arith.mulf %7, %10 : vector<16x1024xf32>
    %cst_9 = arith.constant dense<0.000000e+00> : vector<16xf32>
    %12 = vector.multi_reduction <add>, %11, %cst_9 [1] : vector<16x1024xf32> to vector<16xf32>
    %13 = vector.shape_cast %12 : vector<16xf32> to vector<16x1xf32>
    %c0_10 = arith.constant 0 : index
    %c0_11 = arith.constant 0 : index
    %14 = memref.load %arg5[%c0_10, %c0_11] : memref<1x1xf32, #tpu.memory_space<smem>>
    %15 = vector.broadcast %14 : f32 to vector<16x1xf32>
    %16 = arith.addf %13, %15 : vector<16x1xf32>
    %17 = math.tanh %16 : vector<16x1xf32>
    %18 = vector.shape_cast %17 : vector<16x1xf32> to vector<16x1xf32>
    %19 = vector.broadcast %18 : vector<16x1xf32> to vector<16x128xf32>
    %c0_12 = arith.constant 0 : index
    %c0_13 = arith.constant 0 : index
    %20 = vector.load %arg7[%c0_12, %c0_13] : memref<16x128xf32, #tpu.memory_space<vmem>>, vector<16x128xf32>
    tpu.vector_store %arg7[%c0_12, %c0_13], %19 {strides = array<i32>} : memref<16x128xf32, #tpu.memory_space<vmem>>, vector<16x128xf32>,
    return
  }
  func.func @transform_0(%arg0: i32) -> (i32, i32) {
    %c0_i32 = arith.constant 0 : i32
    %c0_i32_0 = arith.constant 0 : i32
    return %arg0, %c0_i32 : i32, i32
  }
  func.func @transform_1(%arg0: i32) -> (i32, i32) {
    %c0_i32 = arith.constant 0 : i32
    %c0_i32_0 = arith.constant 0 : i32
    %c0_i32_1 = arith.constant 0 : i32
    return %c0_i32, %c0_i32_0 : i32, i32
  }
  func.func @transform_2(%arg0: i32) -> (i32, i32) {
    %c0_i32 = arith.constant 0 : i32
    %c0_i32_0 = arith.constant 0 : i32
    %c0_i32_1 = arith.constant 0 : i32
    return %c0_i32, %c0_i32_0 : i32, i32
  }
  func.func @transform_3(%arg0: i32) -> (i32, i32) {
    %c0_i32 = arith.constant 0 : i32
    %c0_i32_0 = arith.constant 0 : i32
    %c0_i32_1 = arith.constant 0 : i32
    return %c0_i32, %c0_i32_0 : i32, i32
  }
  func.func @transform_4(%arg0: i32) -> (i32, i32) {
    %c0_i32 = arith.constant 0 : i32
    %c0_i32_0 = arith.constant 0 : i32
    %c0_i32_1 = arith.constant 0 : i32
    return %c0_i32, %c0_i32_0 : i32, i32
  }
  func.func @transform_5(%arg0: i32) -> (i32, i32) {
    %c0_i32 = arith.constant 0 : i32
    %c0_i32_0 = arith.constant 0 : i32
    return %arg0, %c0_i32 : i32, i32
  }
  func.func @transform_6(%arg0: i32) -> (i32, i32) {
    %c0_i32 = arith.constant 0 : i32
    %c0_i32_0 = arith.constant 0 : i32
    return %arg0, %c0_i32 : i32, i32
  }
}

</mosaic_0001>

<bundles_post_ra>
// kernel: base_game_model_forward.1
= control target key start
LH: loop header
LB: loop body
LE: loop exit
PB: predicated region body
PF: predicated region fallthrough
CT: control target
= control target key end

     0   :  { %13 = vsyncpa [#allocation4], 0  ;;  %s1560_s21 = smov [#allocation3]   ;;  %s1729_s0 = inlined_call_operand.vmem [shape: bf16[16,1024], index: 0, kind: input, shape index: {}]   ;;  %s1730_s1 = inlined_call_operand.hbm [shape: bf16[1024,256], index: 1, kind: input, shape index: {}]   ;;  %s1731_s2 = inlined_call_operand.vmem [shape: f32[1,256], index: 2, kind: input, shape index: {}]   ;;  %s1732_s3 = inlined_call_operand.vmem [shape: bf16[1,1024], index: 3, kind: input, shape index: {}]   ;;  %s1733_s4 = inlined_call_operand.<no memory space> [shape: f32[1,1], index: 4, kind: input, shape index: {}]   ;;  %s1734_s5 = inlined_call_operand.vmem [shape: f32[16,256], index: 5, kind: output, shape index: {0}]   ;;  %s1735_s6 = inlined_call_operand.vmem [shape: f32[16,128], index: 6, kind: output, shape index: {1}]  }
   0x1   :  { %s21_s22 = sshll.u32 %s1560_s21, 4  ;;  %s1536_s25 = scalar_lea.hbm %s1730_s1, 16384  ;;  %s22_s22 = int_to_ptr.vmem [resolvable:$true] %s21_s22 }
   0x2   :  { %p1537_p0 = scmp.ne.s32.totalorder %s1730_s1, %s1536_s25  ;;  %p1540_p1 = scmp.lt.u32.totalorder %s1536_s25, %s1730_s1 }
   0x4   :  { %p1542_p2 = pnand %p1540_p1, %p1537_p0 }
   0x6   :  { %1545 = shalt.err (!%p1542_p2)
}
   0x7   :  { %s1546_s30 = scalar_lea.vmem %s22_s22, 16384  ;;  %p1551_p4 = scmp.lt.s32.totalorder %s22_s22, %s22_s22 }
   0x8   :  { %p1547_p3 = scmp.ne.s32.totalorder %s22_s22, %s1546_s30  ;;  %p1552_p5 = scmp.lt.s32.totalorder %s1546_s30, %s1546_s30 }
   0xa   :  { %p1553_p6 = por %p1552_p5, %p1551_p4 }
   0xc   :  { %p1554_p7 = pnand %p1553_p6, %p1547_p3 }
   0xe   :  { %1557 = shalt.err (!%p1554_p7)
}
   0xf   :  { %s1561_s7 = smov 128   ;;  %s1562_s8 = smov 8  }
  0x10   :  { %27 = dma.hbm_to_vmem [thread:$0]  %s1730_s1, 16384, %s22_s22, [#allocation4], %s1561_s7, %s1561_s7, %s1562_s8  }
  0x11   :  { %1558 = dma.done.wait [#allocation4], 16384  }
  0x12   :  { %1559 = vsyncadd [#allocation4], 4294950912  ;;  %v1340_v0 = vld [vmem:[#allocation3 + $0x4] ss:$8 sps:$4 sm:$0xff]   ;;  %v1344_v2 = vld [vmem:[#allocation3] ss:$8 sps:$4 sm:$0xff]  }
  0x13   :  { %v1342_v1 = vld [vmem:[#allocation3 + $0x204] ss:$8 sps:$4 sm:$0xff]   ;;  %865 = vmatprep.subr.bf16.mxu1 %v1340_v0  ;;  %v1345_v3 = vld [vmem:[#allocation3 + $0x200] ss:$8 sps:$4 sm:$0xff]   ;;  %v1346_v4 = vld [vmem:[#allocation3 + $0x14] ss:$8 sps:$4 sm:$0xff]  }
  0x14   :  { %951 = vmatprep.subr.bf16.mxu0 %v1342_v1  ;;  %866 = vmatpush1.bf16.msra.mxu1 %v1344_v2  ;;  %v1348_v5 = vld [vmem:[#allocation3 + $0x214] ss:$8 sps:$4 sm:$0xff]   ;;  %v1350_v6 = vld [vmem:[#allocation3 + $0x10] ss:$8 sps:$4 sm:$0xff]   ;;  %v1352_v8 = vld [vmem:[#allocation3 + $0x24] ss:$8 sps:$4 sm:$0xff]  }
  0x15   :  { %952 = vmatpush1.bf16.msra.mxu0 %v1345_v3  ;;  %867 = vmatprep.subr.bf16.mxu1 %v1346_v4  ;;  %v1351_v7 = vld [vmem:[#allocation3 + $0x210] ss:$8 sps:$4 sm:$0xff]   ;;  %v1354_v9 = vld [vmem:[#allocation3 + $0x224] ss:$8 sps:$4 sm:$0xff]   ;;  %v1356_v10 = vld [vmem:[#allocation3 + $0x20] ss:$8 sps:$4 sm:$0xff]  }
  0x16   :  { %953 = vmatprep.subr.bf16.mxu0 %v1348_v5  ;;  %v1357_v11 = vld [vmem:[#allocation3 + $0x220] ss:$8 sps:$4 sm:$0xff]   ;;  %v1358_v12 = vld [vmem:[#allocation3 + $0x34] ss:$8 sps:$4 sm:$0xff]   ;;  %v1362_v14 = vld [vmem:[#allocation3 + $0x30] ss:$8 sps:$4 sm:$0xff]  }
  0x17   :  { %v1360_v13 = vld [vmem:[#allocation3 + $0x234] ss:$8 sps:$4 sm:$0xff]   ;;  %v1363_v15 = vld [vmem:[#allocation3 + $0x230] ss:$8 sps:$4 sm:$0xff]   ;;  %v1364_v16 = vld [vmem:[#allocation3 + $0x44] ss:$8 sps:$4 sm:$0xff]  }
  0x18   :  { %868 = vmatpush1.bf16.msra.mxu1 %v1350_v6  ;;  %v1366_v17 = vld [vmem:[#allocation3 + $0x244] ss:$8 sps:$4 sm:$0xff]   ;;  %v1368_v18 = vld [vmem:[#allocation3 + $0x40] ss:$8 sps:$4 sm:$0xff]   ;;  %v1370_v20 = vld [vmem:[#allocation3 + $0x54] ss:$8 sps:$4 sm:$0xff]  }
  0x19   :  { %954 = vmatpush1.bf16.msra.mxu0 %v1351_v7  ;;  %869 = vmatprep.subr.bf16.mxu1 %v1352_v8  ;;  %v1369_v19 = vld [vmem:[#allocation3 + $0x240] ss:$8 sps:$4 sm:$0xff]   ;;  %v1372_v21 = vld [vmem:[#allocation3 + $0x254] ss:$8 sps:$4 sm:$0xff]   ;;  %v1374_v22 = vld [vmem:[#allocation3 + $0x50] ss:$8 sps:$4 sm:$0xff]   ;;  %v175_v8 = vlaneseq }
  0x1a   :  { %955 = vmatprep.subr.bf16.mxu0 %v1354_v9  ;;  %v1375_v23 = vld [vmem:[#allocation3 + $0x250] ss:$8 sps:$4 sm:$0xff]   ;;  %v1376_v24 = vld [vmem:[#allocation3 + $0x64] ss:$8 sps:$4 sm:$0xff]   ;;  %v1380_v26 = vld [vmem:[#allocation3 + $0x60] ss:$8 sps:$4 sm:$0xff]  }
  0x1b   :  { %v1378_v25 = vld [vmem:[#allocation3 + $0x264] ss:$8 sps:$4 sm:$0xff]   ;;  %v1381_v27 = vld [vmem:[#allocation3 + $0x260] ss:$8 sps:$4 sm:$0xff]   ;;  %v1382_v28 = vld [vmem:[#allocation3 + $0x74] ss:$8 sps:$4 sm:$0xff]  }
  0x1c   :  { %870 = vmatpush1.bf16.msra.mxu1 %v1356_v10  ;;  %v1384_v29 = vld [vmem:[#allocation3 + $0x274] ss:$8 sps:$4 sm:$0xff]   ;;  %v1386_v30 = vld [vmem:[#allocation3 + $0x70] ss:$8 sps:$4 sm:$0xff]   ;;  %v1388_v32 = vld [vmem:[#allocation3 + $0x84] ss:$8 sps:$4 sm:$0xff]  }
  0x1d   :  { %956 = vmatpush1.bf16.msra.mxu0 %v1357_v11  ;;  %871 = vmatprep.subr.bf16.mxu1 %v1358_v12  ;;  %v1387_v31 = vld [vmem:[#allocation3 + $0x270] ss:$8 sps:$4 sm:$0xff]   ;;  %v1390_v33 = vld [vmem:[#allocation3 + $0x284] ss:$8 sps:$4 sm:$0xff]   ;;  %v1392_v34 = vld [vmem:[#allocation3 + $0x80] ss:$8 sps:$4 sm:$0xff]  }
  0x1e   :  { %957 = vmatprep.subr.bf16.mxu0 %v1360_v13  ;;  %v1393_v35 = vld [vmem:[#allocation3 + $0x280] ss:$8 sps:$4 sm:$0xff]   ;;  %v1394_v36 = vld [vmem:[#allocation3 + $0x94] ss:$8 sps:$4 sm:$0xff]   ;;  %v1398_v38 = vld [vmem:[#allocation3 + $0x90] ss:$8 sps:$4 sm:$0xff]  }
  0x1f   :  { %v1396_v37 = vld [vmem:[#allocation3 + $0x294] ss:$8 sps:$4 sm:$0xff]   ;;  %v1399_v39 = vld [vmem:[#allocation3 + $0x290] ss:$8 sps:$4 sm:$0xff]   ;;  %v1400_v40 = vld [vmem:[#allocation3 + $0xa4] ss:$8 sps:$4 sm:$0xff]  }
  0x20   :  { %872 = vmatpush1.bf16.msra.mxu1 %v1362_v14  ;;  %v1402_v41 = vld [vmem:[#allocation3 + $0x2a4] ss:$8 sps:$4 sm:$0xff]   ;;  %v1404_v42 = vld [vmem:[#allocation3 + $0xa0] ss:$8 sps:$4 sm:$0xff]   ;;  %v1406_v44 = vld [vmem:[#allocation3 + $0xb4] ss:$8 sps:$4 sm:$0xff]  }
  0x21   :  { %958 = vmatpush1.bf16.msra.mxu0 %v1363_v15  ;;  %873 = vmatprep.subr.bf16.mxu1 %v1364_v16  ;;  %v1405_v43 = vld [vmem:[#allocation3 + $0x2a0] ss:$8 sps:$4 sm:$0xff]   ;;  %v1408_v45 = vld [vmem:[#allocation3 + $0x2b4] ss:$8 sps:$4 sm:$0xff]   ;;  %v1410_v46 = vld [vmem:[#allocation3 + $0xb0] ss:$8 sps:$4 sm:$0xff]  }
  0x22   :  { %959 = vmatprep.subr.bf16.mxu0 %v1366_v17  ;;  %v1613_v47 = vld [vmem:[%s1729_s0] sm:$0xff]  ;;  %v1411_v48 = vld [vmem:[#allocation3 + $0x2b0] ss:$8 sps:$4 sm:$0xff]   ;;  %v1418_v58 = vld [vmem:[#allocation3 + $0xd4] ss:$8 sps:$4 sm:$0xff]   ;;  %v1641_v16 = vshrl.u32 %v175_v8, 7 }
  0x23   :  { %v1618_v49 = vld [vmem:[%s1729_s0 + $0x20] sm:$0xff]  ;;  %v1625_v53 = vld [vmem:[%s1729_s0 + $0x10] sm:$0xff] }
  0x24   :  { %874 = vmatpush1.bf16.msra.mxu1 %v1368_v18  ;;  %v1412_v50 = vld [vmem:[#allocation3 + $0xc4] ss:$8 sps:$4 sm:$0xff]   ;;  %v1186_v52 = vcombine.high %v1613_v47, %v1618_v49  ;;  %v1630_v54 = vld [vmem:[%s1729_s0 + $0x30] sm:$0xff]  ;;  %v1416_v56 = vld [vmem:[#allocation3 + $0xc0] ss:$8 sps:$4 sm:$0xff]   ;;  %v1185_v10 = vcombine.low %v1613_v47, %v1618_v49 }
  0x25   :  { %960 = vmatpush1.bf16.msra.mxu0 %v1369_v19  ;;  %875 = vmatprep.subr.bf16.mxu1 %v1370_v20  ;;  %v1414_v51 = vld [vmem:[#allocation3 + $0x2c4] ss:$8 sps:$4 sm:$0xff]   ;;  %v1190_v55 = vcombine.high %v1625_v53, %v1630_v54  ;;  %v1417_v57 = vld [vmem:[#allocation3 + $0x2c0] ss:$8 sps:$4 sm:$0xff]   ;;  %v1420_v59 = vld [vmem:[#allocation3 + $0x2d4] ss:$8 sps:$4 sm:$0xff]   ;;  %v1189_v11 = vcombine.low %v1625_v53, %v1630_v54 }
  0x26   :  { %961 = vmatprep.subr.bf16.mxu0 %v1372_v21  ;;  %897 = vmatprep.mubr.bf16.mxu1 %v1186_v52  ;;  %v1422_v60 = vld [vmem:[#allocation3 + $0xd0] ss:$8 sps:$4 sm:$0xff]   ;;  %v1424_v62 = vld [vmem:[#allocation3 + $0xe4] ss:$8 sps:$4 sm:$0xff]   ;;  %v1428_v0 = vld [vmem:[#allocation3 + $0xe0] ss:$8 sps:$4 sm:$0xff]  }
  0x27   :  { %983 = vmatprep.mubr.bf16.mxu0 %v1190_v55  ;;  %v1423_v61 = vld [vmem:[#allocation3 + $0x2d0] ss:$8 sps:$4 sm:$0xff]   ;;  %v1426_v63 = vld [vmem:[#allocation3 + $0x2e4] ss:$8 sps:$4 sm:$0xff]   ;;  %v1429_v1 = vld [vmem:[#allocation3 + $0x2e0] ss:$8 sps:$4 sm:$0xff]  }
  0x28   :  { %876 = vmatpush1.bf16.msra.mxu1 %v1374_v22  ;;  %v1430_v2 = vld [vmem:[#allocation3 + $0xf4] ss:$8 sps:$4 sm:$0xff]   ;;  %v1434_v4 = vld [vmem:[#allocation3 + $0xf0] ss:$8 sps:$4 sm:$0xff]   ;;  %v1438_v6 = vld [vmem:[#allocation3 + $0x104] ss:$8 sps:$4 sm:$0xff]  }
  0x29   :  { %962 = vmatpush1.bf16.msra.mxu0 %v1375_v23  ;;  %877 = vmatprep.subr.bf16.mxu1 %v1376_v24  ;;  %v1432_v3 = vld [vmem:[#allocation3 + $0x2f4] ss:$8 sps:$4 sm:$0xff]   ;;  %v1435_v5 = vld [vmem:[#allocation3 + $0x2f0] ss:$8 sps:$4 sm:$0xff]   ;;  %v1441_v7 = vld [vmem:[#allocation3 + $0x304] ss:$8 sps:$4 sm:$0xff]  }
  0x2a   :  { %963 = vmatprep.subr.bf16.mxu0 %v1378_v25  ;;  %v1436_v9 = vld [vmem:[#allocation3 + $0x100] ss:$8 sps:$4 sm:$0xff]   ;;  %v1444_v13 = vld [vmem:[#allocation3 + $0x114] ss:$8 sps:$4 sm:$0xff]   ;;  %v1442_v17 = vld [vmem:[#allocation3 + $0x110] ss:$8 sps:$4 sm:$0xff]  }
  0x2b   :  { %v1439_v12 = vld [vmem:[#allocation3 + $0x300] ss:$8 sps:$4 sm:$0xff]   ;;  %v1447_v14 = vld [vmem:[#allocation3 + $0x314] ss:$8 sps:$4 sm:$0xff]   ;;  %v1445_v18 = vld [vmem:[#allocation3 + $0x310] ss:$8 sps:$4 sm:$0xff]  }
  0x2c   :  { %878 = vmatpush1.bf16.msra.mxu1 %v1380_v26  ;;  %v1057_v15 = vld [vmem:[%s1732_s3] sm:$0xff]  ;;  %v1644_v21 = vsub.s32 0, %v1641_v16  ;;  %v1068_v23 = vsub.s32 2, %v1641_v16  ;;  %v1456_v26 = vld [vmem:[#allocation3 + $0x134] ss:$8 sps:$4 sm:$0xff]  }
  0x2d   :  { %964 = vmatpush1.bf16.msra.mxu0 %v1381_v27  ;;  %879 = vmatprep.subr.bf16.mxu1 %v1382_v28  ;;  %v1450_v19 = vld [vmem:[#allocation3 + $0x124] ss:$8 sps:$4 sm:$0xff]   ;;  %v1058_v22 = vunpack.c.l.bf16 %v1057_v15  ;;  %v1448_v24 = vld [vmem:[#allocation3 + $0x120] ss:$8 sps:$4 sm:$0xff]   ;;  %v1459_v27 = vld [vmem:[#allocation3 + $0x334] ss:$8 sps:$4 sm:$0xff]  }
  0x2e   :  { %965 = vmatprep.subr.bf16.mxu0 %v1384_v29  ;;  %v1453_v20 = vld [vmem:[#allocation3 + $0x324] ss:$8 sps:$4 sm:$0xff]   ;;  %v1451_v25 = vld [vmem:[#allocation3 + $0x320] ss:$8 sps:$4 sm:$0xff]  }
  0x2f   :  { %v1065_v28 = vrot.slane %v1058_v22, %v1644_v21  ;;  %v1069_v29 = vrot.slane %v1058_v22, %v1068_v23  ;;  %v1475_v8 = vld [vmem:[#allocation3 + $0x360] ss:$8 sps:$4 sm:$0xff]  }
  0x30   :  { %880 = vmatpush1.bf16.msra.mxu1 %v1386_v30  ;;  %v1454_v30 = vld [vmem:[#allocation3 + $0x130] ss:$8 sps:$4 sm:$0xff]  }
  0x31   :  { %966 = vmatpush1.bf16.msra.mxu0 %v1387_v31  ;;  %881 = vmatprep.subr.bf16.mxu1 %v1388_v32  ;;  %v1457_v31 = vld [vmem:[#allocation3 + $0x330] ss:$8 sps:$4 sm:$0xff]   ;;  %v1462_v32 = vld [vmem:[#allocation3 + $0x144] ss:$8 sps:$4 sm:$0xff]  }
  0x32   :  { %967 = vmatprep.subr.bf16.mxu0 %v1390_v33  ;;  %v1465_v33 = vld [vmem:[#allocation3 + $0x344] ss:$8 sps:$4 sm:$0xff]  }
  0x34   :  { %882 = vmatpush1.bf16.msra.mxu1 %v1392_v34  ;;  %v1041_v34 = vunpack.c.l.bf16 %v1613_v47 }
  0x35   :  { %968 = vmatpush1.bf16.msra.mxu0 %v1393_v35  ;;  %883 = vmatprep.subr.bf16.mxu1 %v1394_v36  ;;  %v1072_v35 = vsub.s32 4, %v1641_v16  ;;  %v1076_v36 = vsub.s32 6, %v1641_v16 }
  0x36   :  { %969 = vmatprep.subr.bf16.mxu0 %v1396_v37  ;;  %v1042_v37 = vunpack.c.h.bf16 %v1613_v47 }
  0x37   :  { %v1077_v52 = vrot.slane %v1058_v22, %v1076_v36 }
  0x38   :  { %884 = vmatpush1.bf16.msra.mxu1 %v1398_v38  ;;  %v1105_v38 = vrot.slane %v1065_v28, %v1644_v21 }
  0x39   :  { %970 = vmatpush1.bf16.msra.mxu0 %v1399_v39  ;;  %885 = vmatprep.subr.bf16.mxu1 %v1400_v40  ;;  %v1109_v39 = vrot.slane %v1069_v29, %v1644_v21  ;;  %v1460_v40 = vld [vmem:[#allocation3 + $0x140] ss:$8 sps:$4 sm:$0xff]   ;;  %v1478_v29 = vld [vmem:[#allocation3 + $0x170] ss:$8 sps:$4 sm:$0xff]  }
  0x3a   :  { %971 = vmatprep.subr.bf16.mxu0 %v1402_v41  ;;  %v1059_v41 = vunpack.c.h.bf16 %v1057_v15  ;;  %v1480_v15 = vld [vmem:[#allocation3 + $0x174] ss:$8 sps:$4 sm:$0xff]  }
  0x3b   :  { %v1135_v47 = vmul.f32 %v1109_v39, %v1042_v37 }
  0x3c   :  { %886 = vmatpush1.bf16.msra.mxu1 %v1404_v42  ;;  %v1463_v42 = vld [vmem:[#allocation3 + $0x340] ss:$8 sps:$4 sm:$0xff]   ;;  %v1081_v55 = vrot.slane %v1059_v41, %v1644_v21 }
  0x3d   :  { %972 = vmatpush1.bf16.msra.mxu0 %v1405_v43  ;;  %887 = vmatprep.subr.bf16.mxu1 %v1406_v44  ;;  %v1049_v43 = vunpack.c.l.bf16 %v1618_v49  ;;  %v1050_v44 = vunpack.c.h.bf16 %v1618_v49  ;;  %v1477_v49 = vld [vmem:[#allocation3 + $0x364] ss:$8 sps:$4 sm:$0xff]  }
  0x3e   :  { %973 = vmatprep.subr.bf16.mxu0 %v1408_v45  ;;  %v1468_v45 = vld [vmem:[#allocation3 + $0x154] ss:$8 sps:$4 sm:$0xff]  }
  0x40   :  { %888 = vmatpush1.bf16.msra.mxu1 %v1410_v46  ;;  %v1471_v46 = vld [vmem:[#allocation3 + $0x354] ss:$8 sps:$4 sm:$0xff]  }
  0x41   :  { %974 = vmatpush1.bf16.msra.mxu0 %v1411_v48  ;;  %889 = vmatprep.subr.bf16.mxu1 %v1412_v50  ;;  %v1073_v48 = vrot.slane %v1058_v22, %v1072_v35  ;;  %v1134_v50 = vmul.f32 %v1105_v38, %v1041_v34  ;;  %v1046_v22 = vunpack.c.h.bf16 %v1625_v53 }
  0x42   :  { %975 = vmatprep.subr.bf16.mxu0 %v1414_v51  ;;  %v1466_v51 = vld [vmem:[#allocation3 + $0x150] ss:$8 sps:$4 sm:$0xff]  }
  0x44   :  { %890 = vmatpush1.bf16.msra.mxu1 %v1416_v56  ;;  %v1469_v56 = vld [vmem:[#allocation3 + $0x350] ss:$8 sps:$4 sm:$0xff]  }
  0x45   :  { %976 = vmatpush1.bf16.msra.mxu0 %v1417_v57  ;;  %891 = vmatprep.subr.bf16.mxu1 %v1418_v58  ;;  %v1142_v57 = vmul.f32 %v1105_v38, %v1049_v43  ;;  %v1143_v58 = vmul.f32 %v1109_v39, %v1050_v44  ;;  %v1484_v44 = vld [vmem:[#allocation3 + $0x180] ss:$8 sps:$4 sm:$0xff]  }
  0x46   :  { %977 = vmatprep.subr.bf16.mxu0 %v1420_v59  ;;  %v1474_v59 = vld [vmem:[#allocation3 + $0x164] ss:$8 sps:$4 sm:$0xff]  }
  0x48   :  { %892 = vmatpush1.bf16.msra.mxu1 %v1422_v60  ;;  %v1045_v60 = vunpack.c.l.bf16 %v1625_v53  ;;  %v1486_v53 = vld [vmem:[#allocation3 + $0x184] ss:$8 sps:$4 sm:$0xff]  }
  0x49   :  { %978 = vmatpush1.bf16.msra.mxu0 %v1423_v61  ;;  %893 = vmatprep.subr.bf16.mxu1 %v1424_v62  ;;  %v1053_v61 = vunpack.c.l.bf16 %v1630_v54  ;;  %v1085_v62 = vrot.slane %v1059_v41, %v1068_v23 }
  0x4a   :  { %979 = vmatprep.subr.bf16.mxu0 %v1426_v63  ;;  %v1113_v63 = vrot.slane %v1073_v48, %v1644_v21 }
  0x4b   :  { %v1125_v23 = vrot.slane %v1085_v62, %v1644_v21  ;;  %v1501_v62 = vld [vmem:[#allocation3 + $0x3a4] ss:$8 sps:$4 sm:$0xff]  }
  0x4c   :  { %894 = vmatpush1.bf16.msra.mxu1 %v1428_v0  ;;  %v1663_v0 = vld [vmem:[%s1729_s0 + $0x8] sm:$0xff] }
  0x4d   :  { %980 = vmatpush1.bf16.msra.mxu0 %v1429_v1  ;;  %895 = vmatprep.subr.bf16.mxu1 %v1430_v2  ;;  %v1668_v1 = vld [vmem:[%s1729_s0 + $0x28] sm:$0xff]  ;;  %v1673_v2 = vld [vmem:[%s1729_s0 + $0x18] sm:$0xff]  ;;  %v1139_v39 = vmul.f32 %v1125_v23, %v1046_v22 }
  0x4e   :  { %981 = vmatprep.subr.bf16.mxu0 %v1432_v3  ;;  %v1089_v3 = vrot.slane %v1059_v41, %v1072_v35  ;;  %v1489_v35 = vld [vmem:[#allocation3 + $0x384] ss:$8 sps:$4 sm:$0xff]   ;;  %v1048_v38 = vunpack.c.h.bf16 %v1673_v2  ;;  %v1517_v22 = vld [vmem:[#allocation3 + $0x3d0] ss:$8 sps:$4 sm:$0xff]  }
  0x50   :  { %896 = vmatpush1.bf16.msra.mxu1 %v1434_v4  ;;  %v1117_v4 = vrot.slane %v1077_v52, %v1644_v21 }
  0x51   :  { %982 = vmatpush1.bf16.msra.mxu0 %v1435_v5  ;;  %908 = vmatprep.subr.bf16.mxu1 %v1438_v6  ;;  %v1121_v5 = vrot.slane %v1081_v55, %v1644_v21  ;;  %v1150_v6 = vadd.f32 %v1135_v47, %v1134_v50  ;;  %v1492_v50 = vld [vmem:[#allocation3 + $0x194] ss:$8 sps:$4 sm:$0xff]  }
  0x52   :  { %994 = vmatprep.subr.bf16.mxu0 %v1441_v7  ;;  %v1472_v7 = vld [vmem:[#allocation3 + $0x160] ss:$8 sps:$4 sm:$0xff]   ;;  %v1495_v47 = vld [vmem:[#allocation3 + $0x394] ss:$8 sps:$4 sm:$0xff]  }
  0x53   :  { %898 = vmatmul.mubr.bf16.vlgmr.msra.gmra.mrb[0].mxu1 %v1185_v10  ;;  %v1043_v10 = vunpack.c.l.bf16 %v1663_v0 }
  0x54   :  { %984 = vmatmul.mubr.bf16.vlgmr.msra.gmra.mrb[0].mxu0 %v1189_v11  ;;  %909 = vmatpush1.bf16.msra.mxu1 %v1436_v9  ;;  %v1188_v9 = vcombine.high %v1663_v0, %v1668_v1  ;;  %v1051_v11 = vunpack.c.l.bf16 %v1668_v1 }
  0x55   :  { %995 = vmatpush1.bf16.msra.mxu0 %v1439_v12  ;;  %910 = vmatprep.subr.bf16.mxu1 %v1444_v13  ;;  %v1052_v12 = vunpack.c.h.bf16 %v1668_v1  ;;  %v1685_v13 = vld [vmem:[%s1729_s0 + $0x38] sm:$0xff] }
  0x56   :  { %996 = vmatprep.subr.bf16.mxu0 %v1447_v14  ;;  %v1159_v14 = vadd.f32 %v1143_v58, %v1142_v57  ;;  %940 = vmatprep.mubr.bf16.mxu1 %v1188_v9 }
  0x57   :  { %v1145_v28 = vmul.f32 %v1117_v4, %v1052_v12  ;;  %v1510_v12 = vld [vmem:[#allocation3 + $0x1c4] ss:$8 sps:$4 sm:$0xff]  }
  0x58   :  { %911 = vmatpush1.bf16.msra.mxu1 %v1442_v17  ;;  %v1483_v17 = vld [vmem:[#allocation3 + $0x374] ss:$8 sps:$4 sm:$0xff]  }
  0x59   :  { %997 = vmatpush1.bf16.msra.mxu0 %v1445_v18  ;;  %912 = vmatprep.subr.bf16.mxu1 %v1450_v19  ;;  %v1192_v18 = vcombine.high %v1673_v2, %v1685_v13  ;;  %v1044_v19 = vunpack.c.h.bf16 %v1663_v0 }
  0x5a   :  { %998 = vmatprep.subr.bf16.mxu0 %v1453_v20  ;;  %v1093_v20 = vrot.slane %v1059_v41, %v1076_v36  ;;  %v1146_v36 = vmul.f32 %v1121_v5, %v1053_v61  ;;  %v1055_v41 = vunpack.c.l.bf16 %v1685_v13  ;;  %v1498_v61 = vld [vmem:[#allocation3 + $0x1a4] ss:$8 sps:$4 sm:$0xff]  }
  0x5b   :  { %1026 = vmatprep.mubr.bf16.mxu0 %v1192_v18  ;;  %v1516_v18 = vld [vmem:[#allocation3 + $0x1d4] ss:$8 sps:$4 sm:$0xff]  }
  0x5c   :  { %913 = vmatpush1.bf16.msra.mxu1 %v1448_v24  ;;  %v1136_v24 = vmul.f32 %v1113_v63, %v1043_v10  ;;  %v1502_v10 = vld [vmem:[#allocation3 + $0x1b0] ss:$8 sps:$4 sm:$0xff]  }
  0x5d   :  { %999 = vmatpush1.bf16.msra.mxu0 %v1451_v25  ;;  %914 = vmatprep.subr.bf16.mxu1 %v1456_v26  ;;  %v1054_v25 = vunpack.c.h.bf16 %v1630_v54  ;;  %v1137_v26 = vmul.f32 %v1117_v4, %v1044_v19  ;;  %v1133_v54 = vrot.slane %v1093_v20, %v1644_v21  ;;  %v1519_v19 = vld [vmem:[#allocation3 + $0x3d4] ss:$8 sps:$4 sm:$0xff]   ;;  %v1514_v20 = vld [vmem:[#allocation3 + $0x1d0] ss:$8 sps:$4 sm:$0xff]  }
  0x5e   :  { %1000 = vmatprep.subr.bf16.mxu0 %v1459_v27  ;;  %v1144_v27 = vmul.f32 %v1113_v63, %v1051_v11  ;;  %v1151_v34 = vadd.f32 %v1150_v6, %v1136_v24  ;;  %v1499_v6 = vld [vmem:[#allocation3 + $0x3a0] ss:$8 sps:$4 sm:$0xff]   ;;  %v1505_v11 = vld [vmem:[#allocation3 + $0x3b0] ss:$8 sps:$4 sm:$0xff]   ;;  %v1525_v24 = vld [vmem:[#allocation3 + $0x3e4] ss:$8 sps:$4 sm:$0xff]  }
  0x5f   :  { %v1141_v52 = vmul.f32 %v1133_v54, %v1048_v38 }
  0x60   :  { %915 = vmatpush1.bf16.msra.mxu1 %v1454_v30  ;;  %v1481_v30 = vld [vmem:[#allocation3 + $0x370] ss:$8 sps:$4 sm:$0xff]   ;;  %v1160_v37 = vadd.f32 %v1159_v14, %v1144_v27  ;;  %v1513_v14 = vld [vmem:[#allocation3 + $0x3c4] ss:$8 sps:$4 sm:$0xff]   ;;  %v1528_v27 = vld [vmem:[#allocation3 + $0x1f4] ss:$8 sps:$4 sm:$0xff]  }
  0x61   :  { %1001 = vmatpush1.bf16.msra.mxu0 %v1457_v31  ;;  %916 = vmatprep.subr.bf16.mxu1 %v1462_v32  ;;  %v1047_v31 = vunpack.c.l.bf16 %v1673_v2  ;;  %v1129_v32 = vrot.slane %v1089_v3, %v1644_v21 }
  0x62   :  { %1002 = vmatprep.subr.bf16.mxu0 %v1465_v33  ;;  %v1138_v33 = vmul.f32 %v1121_v5, %v1045_v60  ;;  %v1161_v43 = vadd.f32 %v1160_v37, %v1145_v28  ;;  %v1496_v5 = vld [vmem:[#allocation3 + $0x1a0] ss:$8 sps:$4 sm:$0xff]   ;;  %v1531_v28 = vld [vmem:[#allocation3 + $0x3f4] ss:$8 sps:$4 sm:$0xff]  }
  0x63   :  { %v1148_v57 = vmul.f32 %v1129_v32, %v1055_v41 }
  0x64   :  { %917 = vmatpush1.bf16.msra.mxu1 %v1460_v40  ;;  %v1152_v40 = vadd.f32 %v1151_v34, %v1137_v26  ;;  %v1523_v26 = vld [vmem:[#allocation3 + $0x3e0] ss:$8 sps:$4 sm:$0xff]  }
  0x65   :  { %1003 = vmatpush1.bf16.msra.mxu0 %v1463_v42  ;;  %918 = vmatprep.subr.bf16.mxu1 %v1468_v45  ;;  %v1147_v42 = vmul.f32 %v1125_v23, %v1054_v25  ;;  %v1487_v45 = vld [vmem:[#allocation3 + $0x380] ss:$8 sps:$4 sm:$0xff]   ;;  %v1522_v23 = vld [vmem:[#allocation3 + $0x1e4] ss:$8 sps:$4 sm:$0xff]  }
  0x66   :  { %1004 = vmatprep.subr.bf16.mxu0 %v1471_v46  ;;  %v1140_v46 = vmul.f32 %v1129_v32, %v1047_v31  ;;  %v1153_v48 = vadd.f32 %v1152_v40, %v1138_v33  ;;  %v1520_v25 = vld [vmem:[#allocation3 + $0x1e0] ss:$8 sps:$4 sm:$0xff]   ;;  %v1187_v31 = vcombine.low %v1663_v0, %v1668_v1  ;;  %v1191_v32 = vcombine.low %v1673_v2, %v1685_v13 }
  0x67   :  { %v1169_v33 = vstv %s1733_s4  ;;  %v173_v1 = vld [vmem:[%s1731_s2] sm:$0x3]  ;;  %v181_v2 = vsub.s32 1, %v1641_v16 }
  0x68   :  { %919 = vmatpush1.bf16.msra.mxu1 %v1466_v51  ;;  %v1162_v51 = vadd.f32 %v1161_v43, %v1146_v36  ;;  %v1154_v55 = vadd.f32 %v1153_v48, %v1139_v39 }
  0x69   :  { %1005 = vmatpush1.bf16.msra.mxu0 %v1469_v56  ;;  %920 = vmatprep.subr.bf16.mxu1 %v1474_v59  ;;  %v1056_v56 = vunpack.c.h.bf16 %v1685_v13  ;;  %v1490_v59 = vld [vmem:[#allocation3 + $0x190] ss:$8 sps:$4 sm:$0xff]   ;;  %v178_v13 = vrot.slane %v173_v1, %v1644_v21  ;;  %v182_v37 = vrot.slane %v173_v1, %v181_v2 }
  0x6a   :  { %1006 = vmatprep.subr.bf16.mxu0 %v1477_v49  ;;  %v1163_v58 = vadd.f32 %v1162_v51, %v1147_v42  ;;  %v1493_v49 = vld [vmem:[#allocation3 + $0x390] ss:$8 sps:$4 sm:$0xff]   ;;  %v1155_v60 = vadd.f32 %v1154_v55, %v1140_v46 }
  0x6b   :  { %v1149_v3 = vmul.f32 %v1133_v54, %v1056_v56 }
  0x6c   :  { %921 = vmatpush1.bf16.msra.mxu1 %v1472_v7  ;;  %v1156_v63 = vadd.f32 %v1155_v60, %v1141_v52  ;;  %v1164_v4 = vadd.f32 %v1163_v58, %v1148_v57  ;;  %v1504_v7 = vld [vmem:[#allocation3 + $0x1b4] ss:$8 sps:$4 sm:$0xff]  }
  0x6d   :  { %1007 = vmatpush1.bf16.msra.mxu0 %v1475_v8  ;;  %922 = vmatprep.subr.bf16.mxu1 %v1480_v15  ;;  %v1507_v8 = vld [vmem:[#allocation3 + $0x3b4] ss:$8 sps:$4 sm:$0xff]   ;;  %v1508_v15 = vld [vmem:[#allocation3 + $0x1c0] ss:$8 sps:$4 sm:$0xff]  }
  0x6e   :  { %1008 = vmatprep.subr.bf16.mxu0 %v1483_v17  ;;  %1157 = vadd.xlane.f32.xlu0 %v1156_v63  ;;  %v1165_v9 = vadd.f32 %v1164_v4, %v1149_v3  ;;  %v1511_v17 = vld [vmem:[#allocation3 + $0x3c0] ss:$8 sps:$4 sm:$0xff]  }
  0x70   :  { %923 = vmatpush1.bf16.msra.mxu1 %v1478_v29  ;;  %v1526_v29 = vld [vmem:[#allocation3 + $0x1f0] ss:$8 sps:$4 sm:$0xff]  }
  0x71   :  { %1009 = vmatpush1.bf16.msra.mxu0 %v1481_v30  ;;  %924 = vmatprep.subr.bf16.mxu1 %v1486_v53  ;;  %v1529_v30 = vld [vmem:[#allocation3 + $0x3f0] ss:$8 sps:$4 sm:$0xff]  }
  0x72   :  { %1010 = vmatprep.subr.bf16.mxu0 %v1489_v35  ;;  %1166 = vadd.xlane.f32.xlu0 %v1165_v9 }
  0x74   :  { %925 = vmatpush1.bf16.msra.mxu1 %v1484_v44 }
  0x75   :  { %1011 = vmatpush1.bf16.msra.mxu0 %v1487_v45  ;;  %926 = vmatprep.subr.bf16.mxu1 %v1492_v50 }
  0x76   :  { %1012 = vmatprep.subr.bf16.mxu0 %v1495_v47 }
  0x78   :  { %927 = vmatpush1.bf16.msra.mxu1 %v1490_v59 }
  0x79   :  { %1013 = vmatpush1.bf16.msra.mxu0 %v1493_v49  ;;  %928 = vmatprep.subr.bf16.mxu1 %v1498_v61 }
  0x7a   :  { %1014 = vmatprep.subr.bf16.mxu0 %v1501_v62 }
  0x7c   :  { %929 = vmatpush1.bf16.msra.mxu1 %v1496_v5 }
  0x7d   :  { %1015 = vmatpush1.bf16.msra.mxu0 %v1499_v6  ;;  %930 = vmatprep.subr.bf16.mxu1 %v1504_v7 }
  0x7e   :  { %1016 = vmatprep.subr.bf16.mxu0 %v1507_v8 }
  0x80   :  { %931 = vmatpush1.bf16.msra.mxu1 %v1502_v10 }
  0x81   :  { %1017 = vmatpush1.bf16.msra.mxu0 %v1505_v11  ;;  %932 = vmatprep.subr.bf16.mxu1 %v1510_v12 }
  0x82   :  { %1018 = vmatprep.subr.bf16.mxu0 %v1513_v14 }
  0x84   :  { %933 = vmatpush1.bf16.msra.mxu1 %v1508_v15 }
  0x85   :  { %1019 = vmatpush1.bf16.msra.mxu0 %v1511_v17  ;;  %934 = vmatprep.subr.bf16.mxu1 %v1516_v18 }
  0x86   :  { %1020 = vmatprep.subr.bf16.mxu0 %v1519_v19 }
  0x88   :  { %935 = vmatpush1.bf16.msra.mxu1 %v1514_v20 }
  0x89   :  { %1021 = vmatpush1.bf16.msra.mxu0 %v1517_v22  ;;  %936 = vmatprep.subr.bf16.mxu1 %v1522_v23 }
  0x8a   :  { %1022 = vmatprep.subr.bf16.mxu0 %v1525_v24 }
  0x8c   :  { %937 = vmatpush1.bf16.msra.mxu1 %v1520_v25 }
  0x8d   :  { %1023 = vmatpush1.bf16.msra.mxu0 %v1523_v26  ;;  %938 = vmatprep.subr.bf16.mxu1 %v1528_v27 }
  0x8e   :  { %1024 = vmatprep.subr.bf16.mxu0 %v1531_v28 }
  0x90   :  { %939 = vmatpush1.bf16.msra.mxu1 %v1526_v29 }
  0x91   :  { %1025 = vmatpush1.bf16.msra.mxu0 %v1529_v30 }
  0x93   :  { %941 = vmatmul.mubr.bf16.vlgmr.msra.gmra.mrb[0].mxu1 %v1187_v31 }
  0x94   :  { %1027 = vmatmul.mubr.bf16.vlgmr.msra.gmra.mrb[0].mxu0 %v1191_v32 }
  0xfb   :  { %v1158_v34 = vpop.xlane.xlu0 %1157 }
  0xfc   :  { %v1170_v53 = vadd.f32 %v1169_v33, %v1158_v34 }
  0xfe   :  { %1532 = vtanh.f32 %v1170_v53 }
  0xff   :  { %v1167_v35 = vpop.xlane.xlu0 %1166 }
 0x100   :  { %v1171_v54 = vadd.f32 %v1169_v33, %v1167_v35 }
 0x102   :  { %1534 = vtanh.f32 %v1171_v54 }
 0x108   :  { %v1533_v36 = vpop.eup %1532 }
 0x109   :  { %1174 = vst [vmem:[%s1735_s6] sm:$0xff] %v1533_v36 }
 0x10c   :  { %v1535_v0 = vpop.eup %1534 }
 0x10d   :  { %1175 = vst [vmem:[%s1735_s6 + $0x8] sm:$0xff] %v1535_v0 }
 0x166   :  { %v942_v38 = vpop.f32.mrb[0].mxu1 }
 0x167   :  { %v1028_v39 = vpop.f32.mrb[0].mxu0  ;;  %v1321_v40 = vadd.f32 %v942_v38, %v178_v13  ;;  %v944_v41 = vpop.f32.mrb[1].mxu1 }
 0x168   :  { %v1030_v42 = vpop.f32.mrb[1].mxu0  ;;  %v1323_v43 = vadd.f32 %v944_v41, %v182_v37  ;;  %v946_v44 = vpop.f32.mrb[2].mxu1 }
 0x169   :  { %v1032_v45 = vpop.f32.mrb[2].mxu0  ;;  %v1322_v46 = vadd.f32 %v1321_v40, %v1028_v39  ;;  %v1325_v48 = vadd.f32 %v946_v44, %v178_v13  ;;  %v948_v50 = vpop.f32.mrb[3].mxu1 }
 0x16a   :  { %v1034_v47 = vpop.f32.mrb[3].mxu0  ;;  %v1324_v51 = vadd.f32 %v1323_v43, %v1030_v42  ;;  %v1327_v52 = vadd.f32 %v948_v50, %v182_v37 }
 0x16b   :  { %1037 = vst [vmem:[%s1734_s5] sm:$0xff] %v1322_v46  ;;  %v1326_v16 = vadd.f32 %v1325_v48, %v1032_v45 }
 0x16c   :  { %1038 = vst [vmem:[%s1734_s5 + $0x8] sm:$0xff] %v1324_v51  ;;  %v1328_v21 = vadd.f32 %v1327_v52, %v1034_v47 }
 0x16d   :  { %1039 = vst [vmem:[%s1734_s5 + $0x10] sm:$0xff] %v1326_v16 }
 0x16e   :  { %1040 = vst [vmem:[%s1734_s5 + $0x18] sm:$0xff] %v1328_v21 }
 0x16f   :  { %1184 = vsyncpa [#allocation4], 1 }

</bundles_post_ra>
